<compile_context>
chip_gen: v5e
topology: v5e:2x2
jax: 0.10.0
libtpu: 0.0.40
codegen_flags: <defaults>
</compile_context>

<pallas_src>
import jax
import jax.numpy as jnp
from jax.experimental import pallas as pl
from jax.experimental.pallas import tpu as pltpu

N_IN = 8     # input features (glucose, insulin, BMI, ...)
N_HID = 6    # hidden neurons
N_OUT = 1    # single yes/no output

PACK = 16                  # samples packed per 128-lane row: PACK * N_IN == 128
LANES = PACK * N_IN        # 128
HID_COLS = PACK * N_HID    # 96
SUBLANE = 16               # row-tile granularity (valid for both f32 and bf16 blocks)
MIN_ROWS_PER_STEP = 2048   # 1 MiB f32 x-tile -> per-step overhead (~0.35us) stays <5%


def _round_up(x: int, m: int) -> int:
    return ((x + m - 1) // m) * m


def _vmem_capacity_bytes() -> int:
    try:
        return int(pltpu.get_tpu_info().vmem_capacity_bytes)
    except Exception:
        return 64 * 1024 * 1024   # conservative fallback (v7x-sized)


def perceptron_kernel(x_ref, w1_ref, b1_ref, w2_ref, b2_ref, o_ref):
    """One batch tile; 16 samples are packed per 128-lane row.

    x_ref : [bt, 128]   row r holds features of 16 consecutive samples
    w1_ref: [128, 96]   kron(I_16, fc1.weight^T)   (resident across the grid)
    b1_ref: [1, 96]     tile(fc1.bias, 16)
    w2_ref: [96, 16]    kron(I_16, fc2.weight^T)
    b2_ref: [1, 16]     tile(fc2.bias, 16)
    o_ref : [bt, 16]    sigmoid outputs, 16 samples per row
    """
    # fc1 + ReLU on the MXU (block-diagonal weights -> one dot covers 16 samples/row).
    h = jnp.dot(x_ref[...], w1_ref[...], preferred_element_type=jnp.float32)
    h = jnp.maximum(h + b1_ref[...], 0.0)
    # fc2 on the MXU.
    z = jnp.dot(h, w2_ref[...], preferred_element_type=jnp.float32) + b2_ref[...]
    # sigmoid(z) = 0.5 * tanh(z/2) + 0.5 : a single EUP op per element, exact.
    o_ref[...] = 0.5 * jnp.tanh(0.5 * z) + 0.5


def simple_perceptron(x, w1, b1, w2, b2, *, block_rows=None):
    """Forward pass of SimplePerceptron.

    x  : [B, 8] float32 or bfloat16 (torch layout)
    w1 : [6, 8] fc1 weight (torch [out, in]);  b1 : [6]
    w2 : [1, 6] fc2 weight;                    b2 : [1]
    Returns [B, 1] float32, matching the torch module's output.
    block_rows: optional override of the per-grid-step row tile (1 row = 16 samples).
    """
    B = x.shape[0]
    assert x.shape == (B, N_IN)
    if x.dtype not in (jnp.bfloat16, jnp.float32):
        x = x.astype(jnp.float32)
    in_dtype = x.dtype

    # Pack 16 samples per 128-lane row.  When B % 16 == 0 this reshape is a pure
    # bitcast (zero HBM traffic); otherwise a small pad (one copy) is unavoidable.
    b16 = _round_up(B, PACK)
    if b16 != B:
        x = jnp.pad(x, ((0, b16 - B), (0, 0)))
    rows = b16 // PACK
    x_view = x.reshape(rows, LANES)                                         # [R, 128]

    # Host-side block-diagonal parameter expansion (tiny, one-time).
    eye = jnp.eye(PACK, dtype=jnp.float32)
    w1_big = jnp.kron(eye, jnp.asarray(w1, jnp.float32).T).astype(in_dtype)  # [128, 96]
    b1_big = jnp.tile(jnp.asarray(b1, jnp.float32), PACK).reshape(1, HID_COLS)
    w2_big = jnp.kron(eye, jnp.asarray(w2, jnp.float32).T)                   # [96, 16]
    b2_big = jnp.tile(jnp.asarray(b2, jnp.float32), PACK).reshape(1, PACK)

    # Per-generation tile / VMEM budget:
    #   128 MiB VMEM (v5e/v6e): 8192-row (4 MiB f32) x-tiles, scoped limit 96 MiB
    #    64 MiB VMEM (v7x)    : 4096-row (2 MiB f32) x-tiles, scoped limit 48 MiB
    vmem_cap = _vmem_capacity_bytes()
    rows_cap = 8192 if vmem_cap > (64 << 20) else 4096
    vmem_limit = min((vmem_cap * 3) // 4, 96 << 20)

    if block_rows is None:
        n_steps = pl.cdiv(rows, rows_cap)
        if n_steps == 1 and rows >= 2 * MIN_ROWS_PER_STEP:
            n_steps = 2            # give the second TensorCore work on v7x
        elif n_steps > 1 and n_steps % 2:
            n_steps += 1           # even step count for megacore balance
        bt = _round_up(pl.cdiv(rows, n_steps), SUBLANE)
    else:
        bt = _round_up(max(int(block_rows), 1), SUBLANE)
    if bt >= rows:
        bt = rows                  # single full-extent block (always legal)
    grid = (pl.cdiv(rows, bt),)    # ragged tail -> masked boundary block

    out = pl.pallas_call(
        perceptron_kernel,
        out_shape=jax.ShapeDtypeStruct((rows, PACK), jnp.float32),
        grid=grid,
        in_specs=[
            pl.BlockSpec((bt, LANES), lambda i: (i, 0)),         # x tile streams / double-buffers
            pl.BlockSpec((LANES, HID_COLS), lambda i: (0, 0)),   # params stay resident in VMEM
            pl.BlockSpec((1, HID_COLS), lambda i: (0, 0)),
            pl.BlockSpec((HID_COLS, PACK), lambda i: (0, 0)),
            pl.BlockSpec((1, PACK), lambda i: (0, 0)),
        ],
        out_specs=pl.BlockSpec((bt, PACK), lambda i: (i, 0)),
        compiler_params=pltpu.CompilerParams(
            dimension_semantics=("parallel",),                   # batch rows are independent
            vmem_limit_bytes=int(vmem_limit),
        ),
    )(x_view, w1_big, b1_big, w2_big, b2_big)

    # [R, 16] -> [B16] (bitcast) -> drop pad -> [B, 1] (torch output shape).
    return out.reshape(b16)[:B].reshape(B, 1)


def init_params(key):
    """nn.Linear-style init (uniform +/- 1/sqrt(fan_in)), stored in torch [out, in] layout."""
    k1, k2, k3, k4 = jax.random.split(key, 4)
    bound1 = 1.0 / jnp.sqrt(jnp.float32(N_IN))
    bound2 = 1.0 / jnp.sqrt(jnp.float32(N_HID))
    w1 = jax.random.uniform(k1, (N_HID, N_IN), jnp.float32, -bound1, bound1)
    b1 = jax.random.uniform(k2, (N_HID,), jnp.float32, -bound1, bound1)
    w2 = jax.random.uniform(k3, (N_OUT, N_HID), jnp.float32, -bound2, bound2)
    b2 = jax.random.uniform(k4, (N_OUT,), jnp.float32, -bound2, bound2)
    return w1, b1, w2, b2


def reference(x, w1, b1, w2, b2):
    x = x.astype(jnp.float32)
    h = jnp.maximum(jnp.dot(x, w1.T, precision=jax.lax.Precision.HIGHEST) + b1, 0.0)
    z = jnp.dot(h, w2.T, precision=jax.lax.Precision.HIGHEST) + b2
    return jax.nn.sigmoid(z)


if __name__ == "__main__":
    key = jax.random.PRNGKey(0)
    kp, kx1, kx2 = jax.random.split(key, 3)
    w1, b1, w2, b2 = init_params(kp)

    # 1) Tiny demo batch: 2 "patients" x 8 features.
    x1 = jax.random.normal(kx1, (2, N_IN), jnp.float32)
    out1 = jax.block_until_ready(simple_perceptron(x1, w1, b1, w2, b2))
    assert out1.shape == (2, 1)
    assert jnp.allclose(out1, reference(x1, w1, b1, w2, b2), atol=2e-3), "small-batch mismatch"

    # 2) Non-multiple-of-16 batch with a forced multi-step grid: exercises the
    #    pack padding, resident params, and the masked boundary block.
    x2 = jax.random.normal(kx2, (1000, N_IN), jnp.float32)
    out2 = jax.block_until_ready(simple_perceptron(x2, w1, b1, w2, b2, block_rows=16))
    assert out2.shape == (1000, 1)
    assert jnp.allclose(out2, reference(x2, w1, b1, w2, b2), atol=2e-3), "gridded-batch mismatch"

    # 3) bf16 input path (read traffic halved; accumulation stays f32 on the MXU).
    x3 = x2.astype(jnp.bfloat16)
    out3 = jax.block_until_ready(simple_perceptron(x3, w1, b1, w2, b2))
    ref3 = reference(x3.astype(jnp.float32),
                     w1.astype(jnp.bfloat16).astype(jnp.float32), b1, w2, b2)
    assert out3.shape == (1000, 1)
    assert jnp.allclose(out3, ref3, atol=2e-3), "bf16 mismatch"

    print("KERNEL_OK")
</pallas_src>

<mosaic_0001>
module attributes {stable_mosaic.version = 11 : i64} {
  func.func @perceptron_kernel(%arg0: i32, %arg1: memref<1x128xf32, #tpu.memory_space<vmem>>, %arg2: memref<128x96xf32, #tpu.memory_space<vmem>>, %arg3: memref<1x96xf32, #tpu.memory_space<vmem>>, %arg4: memref<96x16xf32, #tpu.memory_space<vmem>>, %arg5: memref<1x16xf32, #tpu.memory_space<vmem>>, %arg6: memref<1x16xf32, #tpu.memory_space<vmem>>) attributes {dimension_semantics = [#tpu.dimension_semantics<parallel>], iteration_bounds = array<i64: 1>, scalar_prefetch = 0 : i64, scratch_operands = 0 : i64, tpu.core_type = #tpu.core_type<tc>, window_params = [{transform_indices = @transform_0, window_bounds = array<i64: 1, 128>}, {pipeline_mode = #tpu.pipeline_mode<synchronous>, transform_indices = @transform_1, window_bounds = array<i64: 128, 96>}, {pipeline_mode = #tpu.pipeline_mode<synchronous>, transform_indices = @transform_2, window_bounds = array<i64: 1, 96>}, {pipeline_mode = #tpu.pipeline_mode<synchronous>, transform_indices = @transform_3, window_bounds = array<i64: 96, 16>}, {pipeline_mode = #tpu.pipeline_mode<synchronous>, transform_indices = @transform_4, window_bounds = array<i64: 1, 16>}, {transform_indices = @transform_5, window_bounds = array<i64: 1, 16>}]} {
    %c0 = arith.constant 0 : index
    %c0_0 = arith.constant 0 : index
    %0 = vector.load %arg1[%c0, %c0_0] : memref<1x128xf32, #tpu.memory_space<vmem>>, vector<1x128xf32>
    %c0_1 = arith.constant 0 : index
    %c0_2 = arith.constant 0 : index
    %1 = vector.load %arg2[%c0_1, %c0_2] : memref<128x96xf32, #tpu.memory_space<vmem>>, vector<128x96xf32>
    %cst = arith.constant dense<0.000000e+00> : vector<1x96xf32>
    %2 = tpu.matmul %0, %1, %cst {dimension_numbers = #tpu.dot_dimension_numbers<[1], [0], [0], [1], [0, 0, 1, 1], [], []>} : vector<1x128xf32>, vector<128x96xf32>, vector<1x96xf32> -> vector<1x96xf32>
    %c0_3 = arith.constant 0 : index
    %c0_4 = arith.constant 0 : index
    %3 = vector.load %arg3[%c0_3, %c0_4] : memref<1x96xf32, #tpu.memory_space<vmem>>, vector<1x96xf32>
    %4 = arith.addf %2, %3 : vector<1x96xf32>
    %cst_5 = arith.constant 0.000000e+00 : f32
    %5 = vector.broadcast %cst_5 : f32 to vector<1x96xf32>
    %6 = arith.maximumf %4, %5 : vector<1x96xf32>
    %c0_6 = arith.constant 0 : index
    %c0_7 = arith.constant 0 : index
    %7 = vector.load %arg4[%c0_6, %c0_7] : memref<96x16xf32, #tpu.memory_space<vmem>>, vector<96x16xf32>
    %cst_8 = arith.constant dense<0.000000e+00> : vector<1x16xf32>
    %8 = tpu.matmul %6, %7, %cst_8 {dimension_numbers = #tpu.dot_dimension_numbers<[1], [0], [0], [1], [0, 0, 1, 1], [], []>} : vector<1x96xf32>, vector<96x16xf32>, vector<1x16xf32> -> vector<1x16xf32>
    %c0_9 = arith.constant 0 : index
    %c0_10 = arith.constant 0 : index
    %9 = vector.load %arg5[%c0_9, %c0_10] : memref<1x16xf32, #tpu.memory_space<vmem>>, vector<1x16xf32>
    %10 = arith.addf %8, %9 : vector<1x16xf32>
    %cst_11 = arith.constant 5.000000e-01 : f32
    %11 = vector.broadcast %cst_11 : f32 to vector<1x16xf32>
    %12 = arith.mulf %11, %10 : vector<1x16xf32>
    %13 = math.tanh %12 : vector<1x16xf32>
    %cst_12 = arith.constant 5.000000e-01 : f32
    %14 = vector.broadcast %cst_12 : f32 to vector<1x16xf32>
    %15 = arith.mulf %14, %13 : vector<1x16xf32>
    %cst_13 = arith.constant 5.000000e-01 : f32
    %16 = vector.broadcast %cst_13 : f32 to vector<1x16xf32>
    %17 = arith.addf %15, %16 : vector<1x16xf32>
    %c0_14 = arith.constant 0 : index
    %c0_15 = arith.constant 0 : index
    %18 = vector.load %arg6[%c0_14, %c0_15] : memref<1x16xf32, #tpu.memory_space<vmem>>, vector<1x16xf32>
    tpu.vector_store %arg6[%c0_14, %c0_15], %17 {strides = array<i32>} : memref<1x16xf32, #tpu.memory_space<vmem>>, vector<1x16xf32>,
    return
  }
  func.func @transform_0(%arg0: i32) -> (i32, i32) {
    %c0_i32 = arith.constant 0 : i32
    %c0_i32_0 = arith.constant 0 : i32
    return %arg0, %c0_i32 : i32, i32
  }
  func.func @transform_1(%arg0: i32) -> (i32, i32) {
    %c0_i32 = arith.constant 0 : i32
    %c0_i32_0 = arith.constant 0 : i32
    %c0_i32_1 = arith.constant 0 : i32
    return %c0_i32, %c0_i32_0 : i32, i32
  }
  func.func @transform_2(%arg0: i32) -> (i32, i32) {
    %c0_i32 = arith.constant 0 : i32
    %c0_i32_0 = arith.constant 0 : i32
    %c0_i32_1 = arith.constant 0 : i32
    return %c0_i32, %c0_i32_0 : i32, i32
  }
  func.func @transform_3(%arg0: i32) -> (i32, i32) {
    %c0_i32 = arith.constant 0 : i32
    %c0_i32_0 = arith.constant 0 : i32
    %c0_i32_1 = arith.constant 0 : i32
    return %c0_i32, %c0_i32_0 : i32, i32
  }
  func.func @transform_4(%arg0: i32) -> (i32, i32) {
    %c0_i32 = arith.constant 0 : i32
    %c0_i32_0 = arith.constant 0 : i32
    %c0_i32_1 = arith.constant 0 : i32
    return %c0_i32, %c0_i32_0 : i32, i32
  }
  func.func @transform_5(%arg0: i32) -> (i32, i32) {
    %c0_i32 = arith.constant 0 : i32
    %c0_i32_0 = arith.constant 0 : i32
    return %arg0, %c0_i32 : i32, i32
  }
}

</mosaic_0001>

<bundles_post_ra>
// kernel: tpu_custom_call.1
= control target key start
LH: loop header
LB: loop body
LE: loop exit
PB: predicated region body
PF: predicated region fallthrough
CT: control target
= control target key end

     0   :  { %s276_s0 = inlined_call_operand.vmem [shape: f32[1,128], index: 0, kind: input, shape index: {}]   ;;  %s277_s1 = inlined_call_operand.vmem [shape: f32[128,96], index: 1, kind: input, shape index: {}]   ;;  %s278_s2 = inlined_call_operand.vmem [shape: f32[1,96], index: 2, kind: input, shape index: {}]   ;;  %s279_s3 = inlined_call_operand.vmem [shape: f32[96,16], index: 3, kind: input, shape index: {}]   ;;  %s280_s4 = inlined_call_operand.vmem [shape: f32[1,16], index: 4, kind: input, shape index: {}]   ;;  %s281_s5 = inlined_call_operand.hbm [shape: f32[1,16], index: 5, kind: output, shape index: {}]  }
   0x1   :  { %v37_v0 = vld [vmem:[%s277_s1 + $0x78] sm:$0xff]  ;;  %v36_v1 = vld [vmem:[%s277_s1 + $0x70] sm:$0xff]  ;;  %v35_v2 = vld [vmem:[%s277_s1 + $0x68] sm:$0xff] }
   0x2   :  { %39 = vmatpush.msra.mxu0 %v37_v0  ;;  %v34_v3 = vld [vmem:[%s277_s1 + $0x60] sm:$0xff]  ;;  %v71_v4 = vld [vmem:[%s279_s3 + $0x58] sm:$0xff]  ;;  %v70_v6 = vld [vmem:[%s279_s3 + $0x50] sm:$0xff] }
   0x3   :  { %v33_v5 = vld [vmem:[%s277_s1 + $0x58] sm:$0xff]  ;;  %81 = vmatpush.msra.mxu1 %v71_v4  ;;  %v69_v7 = vld [vmem:[%s279_s3 + $0x48] sm:$0xff]  ;;  %v32_v8 = vld [vmem:[%s277_s1 + $0x50] sm:$0xff] }
   0x4   :  { %40 = vmatpush.msra.mxu0 %v36_v1  ;;  %v68_v9 = vld [vmem:[%s279_s3 + $0x40] sm:$0xff] }
   0x5   :  { %82 = vmatpush.msra.mxu1 %v70_v6 }
   0x6   :  { %41 = vmatpush.msra.mxu0 %v35_v2 }
   0x8   :  { %42 = vmatpush.msra.mxu0 %v34_v3 }
   0xa   :  { %43 = vmatpush.msra.mxu0 %v33_v5 }
   0xb   :  { %10 = vsyncpa [#allocation3], 0  ;;  %v31_v10 = vld [vmem:[%s277_s1 + $0x48] sm:$0xff]  ;;  %83 = vmatpush.msra.mxu1 %v69_v7  ;;  %v67_v11 = vld [vmem:[%s279_s3 + $0x38] sm:$0xff]  ;;  %vm73_vm0 = vcmask 785408   ;;  %vm101_vm1 = vcmask 122880  }
   0xc   :  { %44 = vmatpush.msra.mxu0 %v32_v8  ;;  %v30_v12 = vld [vmem:[%s277_s1 + $0x40] sm:$0xff]  ;;  %v66_v13 = vld [vmem:[%s279_s3 + $0x30] sm:$0xff]  ;;  %v29_v14 = vld [vmem:[%s277_s1 + $0x38] sm:$0xff] }
   0xd   :  { %84 = vmatpush.msra.mxu1 %v68_v9  ;;  %v65_v15 = vld [vmem:[%s279_s3 + $0x28] sm:$0xff]  ;;  %v28_v16 = vld [vmem:[%s277_s1 + $0x30] sm:$0xff]  ;;  %v64_v17 = vld [vmem:[%s279_s3 + $0x20] sm:$0xff] }
   0xe   :  { %45 = vmatpush.msra.mxu0 %v31_v10  ;;  %v27_v18 = vld [vmem:[%s277_s1 + $0x28] sm:$0xff]  ;;  %v63_v19 = vld [vmem:[%s279_s3 + $0x18] sm:$0xff]  ;;  %v26_v20 = vld [vmem:[%s277_s1 + $0x20] sm:$0xff] }
   0xf   :  { %85 = vmatpush.msra.mxu1 %v67_v11  ;;  %v25_v21 = vld [vmem:[%s277_s1 + $0x18] sm:$0xff]  ;;  %v24_v22 = vld [vmem:[%s277_s1 + $0x10] sm:$0xff]  ;;  %v23_v23 = vld [vmem:[%s277_s1 + $0x8] sm:$0xff] }
  0x10   :  { %46 = vmatpush.msra.mxu0 %v30_v12  ;;  %v22_v24 = vld [vmem:[%s277_s1] sm:$0xff]  ;;  %v62_v26 = vld [vmem:[%s279_s3 + $0x10] sm:$0xff]  ;;  %v61_v27 = vld [vmem:[%s279_s3 + $0x8] sm:$0xff] }
  0x11   :  { %86 = vmatpush.msra.mxu1 %v66_v13  ;;  %v21_v25 = vld [vmem:[%s276_s0] sm:$0x1] }
  0x12   :  { %47 = vmatpush.msra.mxu0 %v29_v14  ;;  %v60_v28 = vld [vmem:[%s279_s3] sm:$0xff]  ;;  %s149_s3 = smov [#allocation2]  }
  0x13   :  { %87 = vmatpush.msra.mxu1 %v65_v15  ;;  %v38_v29 = vld [vmem:[%s278_s2] sm:$0x1]  ;;  %s108_s28 = sshll.u32 %s149_s3, 4  ;;  %s110_s2 = sshll.u32 %s281_s5, 4  ;;  %s109_s28 = int_to_ptr.vmem [resolvable:$true] %s108_s28  ;;  %s111_s2 = int_to_ptr.hbm [resolvable:$true] %s110_s2 }
  0x14   :  { %48 = vmatpush.msra.mxu0 %v28_v16  ;;  %v72_v33 = vld [vmem:[%s280_s4] sm:$0x1] }
  0x15   :  { %88 = vmatpush.msra.mxu1 %v64_v17 }
  0x16   :  { %49 = vmatpush.msra.mxu0 %v27_v18 }
  0x17   :  { %89 = vmatpush.msra.mxu1 %v63_v19 }
  0x18   :  { %50 = vmatpush.msra.mxu0 %v26_v20 }
  0x19   :  { %90 = vmatpush.msra.mxu1 %v62_v26 }
  0x1a   :  { %51 = vmatpush.msra.mxu0 %v25_v21 }
  0x1b   :  { %91 = vmatpush.msra.mxu1 %v61_v27 }
  0x1c   :  { %52 = vmatpush.msra.mxu0 %v24_v22 }
  0x1d   :  { %92 = vmatpush.msra.mxu1 %v60_v28 }
  0x1e   :  { %53 = vmatpush.msra.mxu0 %v23_v23 }
  0x20   :  { %54 = vmatpush.msra.mxu0 %v22_v24 }
  0x21   :  { %55 = vmatmul.f32.vlgmr.msra.gmra.mxu0 %v21_v25 }
  0x9e   :  { %v56_v30 = vpop.f32.mrf.mxu0 }
  0x9f   :  { %v57_v31 = vadd.f32 %v56_v30, %v38_v29 }
  0xa1   :  { %v59_v32 = vmax.f32 %v57_v31, 0.0 }
  0xa3   :  { %119 = vmatmul.msk.f32.vlgmr.msra.gmra.mxu1 %vm73_vm0, %v59_v32 }
 0x120   :  { %v94_v34 = vpop.f32.mrf.mxu1 }
 0x121   :  { %v95_v35 = vadd.f32 %v94_v34, %v72_v33 }
 0x123   :  { %v97_v36 = vmul.f32 0.5, %v95_v35 }
 0x125   :  { %121 = vtanh.f32 %v97_v36 }
 0x12b   :  { %v122_v37 = vpop.eup %121 }
 0x12c   :  { %v99_v38 = vmul.f32 0.5, %v122_v37 }
 0x12e   :  { %v100_v39 = vadd.f32 0.5, %v99_v38 }
 0x130   :  { %102 = vst.msk [vmem:[#allocation2] sm:$0x1] %vm101_vm1, %v100_v39 }
 0x131   :  { %113 = dma.vmem_to_hbm [thread:$0]  %s109_s28, 16, %s111_s2, [#allocation3]  }
 0x132   :  { %147 = dma.done.wait [#allocation3], 16  }
 0x133   :  { %148 = vsyncadd [#allocation3], 4294967280 }
 0x134   :  { %118 = vsyncpa [#allocation3], 1 }

</bundles_post_ra>
